<compile_context>
chip_gen: v5e
topology: v5e:2x2
jax: 0.10.0
libtpu: 0.0.40
codegen_flags: <defaults>
</compile_context>

<pallas_src>
import functools

import jax
import jax.numpy as jnp
from jax.experimental import pallas as pl
from jax.experimental.pallas import tpu as pltpu


def _rmsnorm_kernel(x_ref, w_ref, o_ref, *, inv_dim, eps):
    # x_ref: (tile_rows, dim)  w_ref: (1, dim) f32  o_ref: (tile_rows, dim)
    x = x_ref[...].astype(jnp.float32)
    ss = jnp.sum(x * x, axis=-1, keepdims=True)          # cross-lane -> XLU
    inv = jax.lax.rsqrt(ss * inv_dim + eps)               # transcendental -> EUP
    o_ref[...] = (w_ref[...] * x * inv).astype(o_ref.dtype)


def _vmem_capacity_bytes():
    """Physical VMEM per core; fall back to the smallest (v7x: 64 MiB)."""
    try:
        info = pltpu.get_tpu_info()
        cap = getattr(info, "vmem_capacity_bytes", None)
        if cap:
            return int(cap)
    except Exception:
        pass
    return 64 * 1024 * 1024


def _choose_tiling(rows, dim, dtype):
    itemsize = jnp.dtype(dtype).itemsize
    # Sublane packing: 8 rows for 4-byte, 16 for 2-byte, 32 for 1-byte dtypes.
    sublane = max(8, 32 // max(itemsize, 1))

    vmem_cap = _vmem_capacity_bytes()
    # Scoped VMEM limit: half of physical (64 MiB on v5e/v6e, 32 MiB on v7x).
    vmem_limit = min(vmem_cap // 2, 64 * 1024 * 1024)

    # Per-row VMEM cost: double-buffered input + output tiles in x's dtype,
    # plus ~3 f32-sized temporaries live inside the kernel body.
    bytes_per_row = 4 * dim * itemsize + 3 * dim * 4
    budget = int(vmem_limit * 0.7)                 # ~30% headroom
    tile_rows = max(sublane, budget // max(bytes_per_row, 1))
    tile_rows = min(tile_rows, 1024)               # per-step overhead amortized
    tile_rows = (tile_rows // sublane) * sublane

    # Never make the tile larger than (sublane-rounded) total rows.
    rows_rounded = ((rows + sublane - 1) // sublane) * sublane
    tile_rows = max(min(tile_rows, rows_rounded), sublane)
    return tile_rows, vmem_limit


def rmsnorm(x, weight, eps=1e-6, *, tile_rows=None):
    """RMSNorm over the last axis of x. x: (..., dim), weight: (dim,)."""
    orig_shape = x.shape
    dim = orig_shape[-1]
    rows = 1
    for s in orig_shape[:-1]:
        rows *= s

    x2 = x.reshape(rows, dim)
    # Cast the weight once in the wrapper; constant index_map keeps it resident.
    w2 = weight.reshape(1, dim).astype(jnp.float32)

    auto_tile, vmem_limit = _choose_tiling(rows, dim, x.dtype)
    if tile_rows is None:
        tile_rows = auto_tile

    itemsize = jnp.dtype(x.dtype).itemsize
    kernel = functools.partial(_rmsnorm_kernel, inv_dim=1.0 / dim, eps=eps)

    out = pl.pallas_call(
        kernel,
        out_shape=jax.ShapeDtypeStruct((rows, dim), x.dtype),
        grid_spec=pltpu.PrefetchScalarGridSpec(
            num_scalar_prefetch=0,
            grid=(pl.cdiv(rows, tile_rows),),
            in_specs=[
                pl.BlockSpec((tile_rows, dim), lambda i: (i, 0)),
                pl.BlockSpec((1, dim), lambda i: (0, 0)),
            ],
            out_specs=pl.BlockSpec((tile_rows, dim), lambda i: (i, 0)),
        ),
        compiler_params=pltpu.CompilerParams(
            dimension_semantics=("parallel",),   # row axis shards across v7x's 2 TCs
            vmem_limit_bytes=vmem_limit,
        ),
        cost_estimate=pl.CostEstimate(
            flops=3 * rows * dim,
            transcendentals=rows,
            bytes_accessed=2 * rows * dim * itemsize + dim * 4,
        ),
    )(x2, w2)

    return out.reshape(orig_shape)


def rmsnorm_ref(x, weight, eps=1e-6):
    ms = jnp.mean(jnp.square(x), axis=-1, keepdims=True)
    return weight * x * jax.lax.rsqrt(ms + eps)


if __name__ == "__main__":
    key = jax.random.PRNGKey(0)
    batch, seq, hidden = 2, 8, 32
    x = jax.random.normal(key, (batch, seq, hidden), dtype=jnp.float32)
    # Deterministic parameter init matching nn.Parameter(torch.ones(dim)).
    weight = jnp.ones((hidden,), dtype=jnp.float32)

    out = rmsnorm(x, weight, eps=1e-6)
    jax.block_until_ready(out)

    ref = rmsnorm_ref(x, weight, eps=1e-6)
    assert out.shape == x.shape
    assert jnp.allclose(out, ref, atol=1e-5, rtol=1e-5), "mismatch vs reference"
    print("KERNEL_OK")
</pallas_src>

<mosaic_0001>
module attributes {stable_mosaic.version = 11 : i64} {
  func.func @_rmsnorm_kernel(%arg0: i32, %arg1: memref<16x32xf32, #tpu.memory_space<vmem>>, %arg2: memref<1x32xf32, #tpu.memory_space<vmem>>, %arg3: memref<16x32xf32, #tpu.memory_space<vmem>>) attributes {dimension_semantics = [#tpu.dimension_semantics<parallel>], iteration_bounds = array<i64: 1>, scalar_prefetch = 0 : i64, scratch_operands = 0 : i64, tpu.core_type = #tpu.core_type<tc>, window_params = [{transform_indices = @transform_0, window_bounds = array<i64: 16, 32>}, {pipeline_mode = #tpu.pipeline_mode<synchronous>, transform_indices = @transform_1, window_bounds = array<i64: 1, 32>}, {transform_indices = @transform_2, window_bounds = array<i64: 16, 32>}]} {
    %c0 = arith.constant 0 : index
    %c0_0 = arith.constant 0 : index
    %0 = vector.load %arg1[%c0, %c0_0] : memref<16x32xf32, #tpu.memory_space<vmem>>, vector<16x32xf32>
    %1 = arith.mulf %0, %0 : vector<16x32xf32>
    %cst = arith.constant dense<0.000000e+00> : vector<16xf32>
    %2 = vector.multi_reduction <add>, %1, %cst [1] : vector<16x32xf32> to vector<16xf32>
    %3 = vector.shape_cast %2 : vector<16xf32> to vector<16x1xf32>
    %cst_1 = arith.constant 3.125000e-02 : f32
    %4 = vector.broadcast %cst_1 : f32 to vector<16x1xf32>
    %5 = arith.mulf %3, %4 : vector<16x1xf32>
    %cst_2 = arith.constant 9.99999997E-7 : f32
    %6 = vector.broadcast %cst_2 : f32 to vector<16x1xf32>
    %7 = arith.addf %5, %6 : vector<16x1xf32>
    %8 = math.rsqrt %7 : vector<16x1xf32>
    %c0_3 = arith.constant 0 : index
    %c0_4 = arith.constant 0 : index
    %9 = vector.load %arg2[%c0_3, %c0_4] : memref<1x32xf32, #tpu.memory_space<vmem>>, vector<1x32xf32>
    %10 = vector.broadcast %9 : vector<1x32xf32> to vector<16x32xf32>
    %11 = arith.mulf %10, %0 : vector<16x32xf32>
    %12 = vector.broadcast %8 : vector<16x1xf32> to vector<16x32xf32>
    %13 = arith.mulf %11, %12 : vector<16x32xf32>
    %c0_5 = arith.constant 0 : index
    %c0_6 = arith.constant 0 : index
    %14 = vector.load %arg3[%c0_5, %c0_6] : memref<16x32xf32, #tpu.memory_space<vmem>>, vector<16x32xf32>
    tpu.vector_store %arg3[%c0_5, %c0_6], %13 {strides = array<i32>} : memref<16x32xf32, #tpu.memory_space<vmem>>, vector<16x32xf32>,
    return
  }
  func.func @transform_0(%arg0: i32) -> (i32, i32) {
    %c0_i32 = arith.constant 0 : i32
    %c0_i32_0 = arith.constant 0 : i32
    return %arg0, %c0_i32 : i32, i32
  }
  func.func @transform_1(%arg0: i32) -> (i32, i32) {
    %c0_i32 = arith.constant 0 : i32
    %c0_i32_0 = arith.constant 0 : i32
    %c0_i32_1 = arith.constant 0 : i32
    return %c0_i32, %c0_i32_0 : i32, i32
  }
  func.func @transform_2(%arg0: i32) -> (i32, i32) {
    %c0_i32 = arith.constant 0 : i32
    %c0_i32_0 = arith.constant 0 : i32
    return %arg0, %c0_i32 : i32, i32
  }
}

</mosaic_0001>

<bundles_post_ra>
// kernel: tpu_custom_call.1
= control target key start
LH: loop header
LB: loop body
LE: loop exit
PB: predicated region body
PF: predicated region fallthrough
CT: control target
= control target key end

     0   :  { %7 = vsyncpa [#allocation3], 0  ;;  %s234_s0 = inlined_call_operand.hbm [shape: f32[16,32], index: 0, kind: input, shape index: {}]   ;;  %s235_s1 = inlined_call_operand.hbm [shape: f32[1,32], index: 1, kind: input, shape index: {}]   ;;  %s236_s2 = inlined_call_operand.hbm [shape: f32[16,32], index: 2, kind: output, shape index: {}]  }
   0x1   :  { %8 = vsyncpa [#allocation6], 0 }
   0x2   :  { %9 = vsyncpa [#allocation4], 0  ;;  %s14_s11 = sshll.u32 %s234_s0, 4  ;;  %s195_s12 = smov [#allocation2]   ;;  %s15_s11 = int_to_ptr.hbm [resolvable:$true] %s14_s11 }
   0x3   :  { %s16_s13 = sshll.u32 %s195_s12, 4  ;;  %s28_s16 = sshll.u32 %s235_s1, 4  ;;  %s17_s13 = int_to_ptr.vmem [resolvable:$true] %s16_s13  ;;  %s29_s16 = int_to_ptr.hbm [resolvable:$true] %s28_s16 }
   0x4   :  { %s196_s17 = smov 128   ;;  %s197_s18 = smov 8  }
   0x5   :  { %22 = dma.hbm_to_vmem [thread:$0]  %s15_s11, 256, %s17_s13, [#allocation3], %s196_s17, %s196_s17, %s197_s18  }
   0x6   :  { %s198_s19 = smov [#allocation5]  }
   0x7   :  { %s30_s20 = sshll.u32 %s198_s19, 4  ;;  %s31_s20 = int_to_ptr.vmem [resolvable:$true] %s30_s20 }
   0x8   :  { %33 = dma.hbm_to_vmem [thread:$0]  %s29_s16, 16, %s31_s20, [#allocation6]  }
   0x9   :  { %189 = dma.done.wait [#allocation3], 256  }
   0xa   :  { %190 = vsyncadd [#allocation3], 4294967040 }
   0xb   :  { %191 = dma.done.wait [#allocation6], 16  }
   0xc   :  { %192 = vsyncadd [#allocation6], 4294967280  ;;  %v42_v0 = vld [vmem:[#allocation2] sm:$0xff]  ;;  %vm46_vm0 = vcmask 261120   ;;  %v43_v2 = vld [vmem:[#allocation2 + $0x8] sm:$0xff]  ;;  %s199_s0 = smov [#allocation7]  }
   0xd   :  { %v44_v1 = vmul.f32 %v42_v0, %v42_v0  ;;  %v45_v4 = vmul.f32 %v43_v2, %v43_v2  ;;  %v112_v15 = vld [vmem:[#allocation5] ss:$0 sm:$0xff]  ;;  %s91_s1 = sshll.u32 %s199_s0, 4  ;;  %s93_s23 = sshll.u32 %s236_s2, 4  ;;  %s92_s1 = int_to_ptr.vmem [resolvable:$true] %s91_s1  ;;  %s94_s23 = int_to_ptr.hbm [resolvable:$true] %s93_s23 }
   0xe   :  { %v81_v19 = vmul.f32 %v112_v15, %v42_v0  ;;  %v82_v27 = vmul.f32 %v112_v15, %v43_v2 }
   0xf   :  { %v47_v3 = vsel %vm46_vm0, %v44_v1, 0.0  ;;  %v50_v5 = vsel %vm46_vm0, %v45_v4, 0.0 }
  0x10   :  { %48 = vadd.xlane.f32.xlu0 %v47_v3 }
  0x18   :  { %51 = vadd.xlane.f32.xlu0 %v50_v5 }
  0x83   :  { %v49_v6 = vpop.xlane.xlu0 %48 }
  0x84   :  { %v53_v7 = vmul.f32 0.03125, %v49_v6 }
  0x86   :  { %v55_v8 = vadd.f32 1e-06, %v53_v7 }
  0x88   :  { %113 = vrsqrt.f32 %v55_v8  ;;  %vm63_vm2 = vweird.f32 %v55_v8 }
  0x8b   :  { %v52_v9 = vpop.xlane.xlu0 %51 }
  0x8c   :  { %v54_v10 = vmul.f32 0.03125, %v52_v9 }
  0x8e   :  { %v114_v11 = vpop.eup %113  ;;  %v56_v12 = vadd.f32 1e-06, %v54_v10 }
  0x8f   :  { %v58_v13 = vmul.f32 %v114_v11, %v55_v8  ;;  %vm64_vm1 = vweird.f32 %v114_v11 }
  0x90   :  { %115 = vrsqrt.f32 %v56_v12  ;;  %vm65_vm3 = vmor %vm63_vm2, %vm64_vm1  ;;  %vm73_vm5 = vweird.f32 %v56_v12 }
  0x91   :  { %v59_v14 = vmul.f32 %v114_v11, %v58_v13 }
  0x93   :  { %v60_v16 = vmul.f32 0.5, %v59_v14 }
  0x95   :  { %v61_v17 = vsub.f32 1.5, %v60_v16 }
  0x96   :  { %v116_v18 = vpop.eup %115 }
  0x97   :  { %v62_v20 = vmul.f32 %v114_v11, %v61_v17  ;;  %v68_v21 = vmul.f32 %v116_v18, %v56_v12  ;;  %vm74_vm4 = vweird.f32 %v116_v18 }
  0x98   :  { %vm75_vm6 = vmor %vm73_vm5, %vm74_vm4 }
  0x99   :  { %v66_v22 = vsel %vm65_vm3, %v114_v11, %v62_v20  ;;  %v69_v23 = vmul.f32 %v116_v18, %v68_v21 }
  0x9a   :  { %v83_v24 = vmul.f32 %v81_v19, %v66_v22 }
  0x9b   :  { %v70_v25 = vmul.f32 0.5, %v69_v23 }
  0x9c   :  { %85 = vst.msk [vmem:[#allocation7] sm:$0xff] %vm46_vm0, %v83_v24 }
  0x9d   :  { %v71_v26 = vsub.f32 1.5, %v70_v25 }
  0x9f   :  { %v72_v28 = vmul.f32 %v116_v18, %v71_v26 }
  0xa1   :  { %v76_v29 = vsel %vm75_vm6, %v116_v18, %v72_v28 }
  0xa2   :  { %v84_v30 = vmul.f32 %v82_v27, %v76_v29 }
  0xa4   :  { %86 = vst.msk [vmem:[#allocation7 + $0x8] sm:$0xff] %vm46_vm0, %v84_v30 }
  0xa5   :  { %99 = dma.vmem_to_hbm [thread:$0]  %s92_s1, 256, %s94_s23, [#allocation4], %s196_s17, %s196_s17, %s197_s18  }
  0xa6   :  { %193 = dma.done.wait [#allocation4], 256  }
  0xa7   :  { %194 = vsyncadd [#allocation4], 4294967040 }
  0xa8   :  { %104 = vsyncpa [#allocation3], 1 }
  0xa9   :  { %105 = vsyncpa [#allocation6], 1 }
  0xaa   :  { %106 = vsyncpa [#allocation4], 1 }

</bundles_post_ra>
